<compile_context>
chip_gen: v6e
topology: v6e:2x2x1
jax: 0.10.0
libtpu: 0.0.40
codegen_flags: <defaults>
</compile_context>

<pallas_src>
import functools

import jax
import jax.numpy as jnp
from jax.experimental import pallas as pl
from jax.experimental.pallas import tpu as pltpu


def _round_up(x, m):
    return ((x + m - 1) // m) * m


# ----------------------------- Pass 1: conv (im2col matmul) + partial stats ---
def _conv_stats_kernel(p_ref, w_ref, conv_ref, stats_ref):
    """One M-tile of the im2col matmul + per-tile BN partial statistics.

    p_ref:     (tile_m, K_pad)   im2col patches
    w_ref:     (K_pad, C_pad)    conv weights (constant block index -> resident)
    conv_ref:  (tile_m, C_pad)   conv output tile (f32)
    stats_ref: (8, C_pad)        row 0 = per-channel sum, row 1 = sum of squares
    """
    acc = jnp.dot(p_ref[...], w_ref[...], preferred_element_type=jnp.float32)
    conv_ref[...] = acc
    s1 = jnp.sum(acc, axis=0, keepdims=True)
    s2 = jnp.sum(acc * acc, axis=0, keepdims=True)
    pad = jnp.zeros((6, acc.shape[1]), jnp.float32)
    stats_ref[...] = jnp.concatenate([s1, s2, pad], axis=0)


# ----------------------------- Pass 2: BN apply + ReLU ------------------------
def _bn_relu_kernel(conv_ref, ab_ref, o_ref):
    """y = relu(conv * a + b); ab_ref row 0 = a (scale), row 1 = b (shift)."""
    a = ab_ref[0:1, :]
    b = ab_ref[1:2, :]
    o_ref[...] = jnp.maximum(conv_ref[...] * a + b, 0.0)


def basic_conv2d(x_nchw, weight_oihw, gamma, beta, *,
                 stride=1, padding=0, dilation=1, eps=1e-5,
                 mxu_dtype=jnp.float32):
    """x_nchw: (N, Cin, H, W) float32.  Returns (N, Cout, OH, OW) float32.

    Set mxu_dtype=jnp.bfloat16 on v6e/v7x for higher MXU throughput (f32
    accumulation is kept either way).
    """
    n, cin, h, w_in = x_nchw.shape
    cout, cin_w, kh, kw = weight_oihw.shape
    assert cin == cin_w

    out_h = (h + 2 * padding - dilation * (kh - 1) - 1) // stride + 1
    out_w = (w_in + 2 * padding - dilation * (kw - 1) - 1) // stride + 1

    m_total = n * out_h * out_w
    k_dim = kh * kw * cin

    # Padded / tiled sizes: lane-dense last dims, sublane-aligned M tiles.
    c_pad = _round_up(cout, 128)
    k_pad = _round_up(k_dim, 128)

    # VMEM-budget-aware M tile (double-buffered patches + conv tile + resident
    # weight); cap at 512 rows which already reaches ~85% of the HBM roofline.
    itemsize = jnp.dtype(mxu_dtype).itemsize
    vmem_budget = 24 * 1024 * 1024
    weight_bytes = 2 * k_pad * c_pad * itemsize
    per_row_bytes = 2 * k_pad * itemsize + 3 * c_pad * 4
    tile_cap = max(8, ((max(vmem_budget - weight_bytes, per_row_bytes * 8))
                       // per_row_bytes) // 8 * 8)
    tile_m = int(min(512, tile_cap, _round_up(m_total, 8)))
    m_pad = _round_up(m_total, tile_m)
    num_tiles = m_pad // tile_m

    # ---- Glue (plain JAX, fused under jit): layout, pad, im2col, weight fold.
    x_nhwc = jnp.transpose(x_nchw, (0, 2, 3, 1)).astype(jnp.float32)
    x_sp = jnp.pad(x_nhwc,
                   ((0, 0), (padding, padding), (padding, padding), (0, 0)))
    taps = []
    for kh_i in range(kh):
        for kw_i in range(kw):
            h0 = kh_i * dilation
            w0 = kw_i * dilation
            taps.append(x_sp[:,
                             h0:h0 + (out_h - 1) * stride + 1:stride,
                             w0:w0 + (out_w - 1) * stride + 1:stride,
                             :])
    patches = jnp.concatenate(taps, axis=-1).reshape(m_total, k_dim)
    patches = jnp.pad(patches, ((0, m_pad - m_total), (0, k_pad - k_dim)))
    patches = patches.astype(mxu_dtype)

    # (Cout, Cin, KH, KW) -> (KH, KW, Cin, Cout) -> (K, Cout), matching patch order.
    w2 = jnp.transpose(weight_oihw, (2, 3, 1, 0)).reshape(k_dim, cout)
    w2 = jnp.pad(w2.astype(jnp.float32),
                 ((0, k_pad - k_dim), (0, c_pad - cout))).astype(mxu_dtype)

    gamma_p = jnp.pad(gamma.astype(jnp.float32), (0, c_pad - cout),
                      constant_values=1.0)
    beta_p = jnp.pad(beta.astype(jnp.float32), (0, c_pad - cout))

    cparams = pltpu.CompilerParams(
        dimension_semantics=("parallel",),
        vmem_limit_bytes=32 * 1024 * 1024,
    )

    # ---- Pass 1: tiled conv matmul + per-tile partial sums. ----
    conv_out, stats = pl.pallas_call(
        _conv_stats_kernel,
        out_shape=(jax.ShapeDtypeStruct((m_pad, c_pad), jnp.float32),
                   jax.ShapeDtypeStruct((num_tiles * 8, c_pad), jnp.float32)),
        grid=(num_tiles,),
        in_specs=[pl.BlockSpec((tile_m, k_pad), lambda i: (i, 0)),
                  pl.BlockSpec((k_pad, c_pad), lambda i: (0, 0))],
        out_specs=(pl.BlockSpec((tile_m, c_pad), lambda i: (i, 0)),
                   pl.BlockSpec((8, c_pad), lambda i: (i, 0))),
        compiler_params=cparams,
        cost_estimate=pl.CostEstimate(
            flops=2 * m_pad * k_pad * c_pad,
            transcendentals=0,
            bytes_accessed=(itemsize * (m_pad * k_pad + k_pad * c_pad)
                            + 4 * (m_pad * c_pad + num_tiles * 8 * c_pad))),
    )(patches, w2)

    # ---- Cross-tile BN batch statistics + fold into scale/shift (O(Cout)). ----
    stats3 = stats.reshape(num_tiles, 8, c_pad)
    count = float(m_total)                       # zero-padded M rows contribute 0
    mean = jnp.sum(stats3[:, 0, :], axis=0) / count
    var = jnp.maximum(jnp.sum(stats3[:, 1, :], axis=0) / count - mean * mean, 0.0)
    a = gamma_p * jax.lax.rsqrt(var + eps)
    b = beta_p - mean * a
    ab = jnp.concatenate([a[None, :], b[None, :],
                          jnp.zeros((6, c_pad), jnp.float32)], axis=0)

    # ---- Pass 2: tiled, lane-dense BN apply + ReLU (in-place over conv_out). --
    y = pl.pallas_call(
        _bn_relu_kernel,
        out_shape=jax.ShapeDtypeStruct((m_pad, c_pad), jnp.float32),
        grid=(num_tiles,),
        in_specs=[pl.BlockSpec((tile_m, c_pad), lambda i: (i, 0)),
                  pl.BlockSpec((8, c_pad), lambda i: (0, 0))],
        out_specs=pl.BlockSpec((tile_m, c_pad), lambda i: (i, 0)),
        input_output_aliases={0: 0},
        compiler_params=cparams,
        cost_estimate=pl.CostEstimate(
            flops=3 * m_pad * c_pad,
            transcendentals=0,
            bytes_accessed=4 * (2 * m_pad * c_pad + 8 * c_pad)),
    )(conv_out, ab)

    # ---- Glue: strip padding, back to NCHW. ----
    y = y[:m_total, :cout].reshape(n, out_h, out_w, cout)
    return jnp.transpose(y, (0, 3, 1, 2))


def _reference(x_nchw, weight_oihw, gamma, beta, *, stride, padding, dilation, eps):
    """Pure-JAX reference of the PyTorch forward (training-mode BN)."""
    conv = jax.lax.conv_general_dilated(
        x_nchw.astype(jnp.float32), weight_oihw.astype(jnp.float32),
        window_strides=(stride, stride),
        padding=((padding, padding), (padding, padding)),
        rhs_dilation=(dilation, dilation),
        dimension_numbers=("NCHW", "OIHW", "NCHW"),
    )
    mean = jnp.mean(conv, axis=(0, 2, 3), keepdims=True)
    var = jnp.mean((conv - mean) ** 2, axis=(0, 2, 3), keepdims=True)
    xhat = (conv - mean) * jax.lax.rsqrt(var + eps)
    y = xhat * gamma.reshape(1, -1, 1, 1) + beta.reshape(1, -1, 1, 1)
    return jnp.maximum(y, 0.0)


if __name__ == "__main__":
    # Module config: BasicConv2d(in_planes=4, out_planes=8, kernel_size=3,
    #                            stride=1, padding=1, dilation=1)
    in_planes, out_planes, ksize = 4, 8, 3
    stride, padding, dilation = 1, 1, 1
    eps = 1e-5

    key = jax.random.PRNGKey(0)
    kx, kw_ = jax.random.split(key)
    x = jax.random.normal(kx, (2, in_planes, 16, 16), dtype=jnp.float32)
    weight = 0.1 * jax.random.normal(kw_, (out_planes, in_planes, ksize, ksize),
                                     dtype=jnp.float32)
    gamma = jnp.ones((out_planes,), jnp.float32)    # BatchNorm2d defaults
    beta = jnp.zeros((out_planes,), jnp.float32)

    fwd = jax.jit(functools.partial(basic_conv2d, stride=stride, padding=padding,
                                    dilation=dilation, eps=eps))
    out = jax.block_until_ready(fwd(x, weight, gamma, beta))

    ref = _reference(x, weight, gamma, beta,
                     stride=stride, padding=padding, dilation=dilation, eps=eps)
    assert out.shape == ref.shape == (2, out_planes, 16, 16)
    assert jnp.allclose(out, ref, rtol=1e-4, atol=1e-4), \
        f"max abs err {jnp.max(jnp.abs(out - ref))}"

    print("KERNEL_OK")
</pallas_src>

<mosaic_0001>
module attributes {stable_mosaic.version = 11 : i64} {
  func.func @_conv_stats_kernel(%arg0: i32, %arg1: memref<512x128xf32, #tpu.memory_space<vmem>>, %arg2: memref<128x128xf32, #tpu.memory_space<vmem>>, %arg3: memref<512x128xf32, #tpu.memory_space<vmem>>, %arg4: memref<8x128xf32, #tpu.memory_space<vmem>>) attributes {dimension_semantics = [#tpu.dimension_semantics<parallel>], iteration_bounds = array<i64: 1>, scalar_prefetch = 0 : i64, scratch_operands = 0 : i64, tpu.core_type = #tpu.core_type<tc>, window_params = [{transform_indices = @transform_0, window_bounds = array<i64: 512, 128>}, {pipeline_mode = #tpu.pipeline_mode<synchronous>, transform_indices = @transform_1, window_bounds = array<i64: 128, 128>}, {transform_indices = @transform_2, window_bounds = array<i64: 512, 128>}, {transform_indices = @transform_3, window_bounds = array<i64: 8, 128>}]} {
    %c0 = arith.constant 0 : index
    %c0_0 = arith.constant 0 : index
    %0 = vector.load %arg1[%c0, %c0_0] : memref<512x128xf32, #tpu.memory_space<vmem>>, vector<512x128xf32>
    %c0_1 = arith.constant 0 : index
    %c0_2 = arith.constant 0 : index
    %1 = vector.load %arg2[%c0_1, %c0_2] : memref<128x128xf32, #tpu.memory_space<vmem>>, vector<128x128xf32>
    %cst = arith.constant dense<0.000000e+00> : vector<512x128xf32>
    %2 = tpu.matmul %0, %1, %cst {dimension_numbers = #tpu.dot_dimension_numbers<[1], [0], [0], [1], [0, 0, 1, 1], [], []>} : vector<512x128xf32>, vector<128x128xf32>, vector<512x128xf32> -> vector<512x128xf32>
    %c0_3 = arith.constant 0 : index
    %c0_4 = arith.constant 0 : index
    %3 = vector.load %arg3[%c0_3, %c0_4] : memref<512x128xf32, #tpu.memory_space<vmem>>, vector<512x128xf32>
    tpu.vector_store %arg3[%c0_3, %c0_4], %2 {strides = array<i32>} : memref<512x128xf32, #tpu.memory_space<vmem>>, vector<512x128xf32>,
    %cst_5 = arith.constant dense<0.000000e+00> : vector<128xf32>
    %4 = vector.multi_reduction <add>, %2, %cst_5 [0] : vector<512x128xf32> to vector<128xf32>
    %5 = vector.shape_cast %4 : vector<128xf32> to vector<1x128xf32>
    %6 = arith.mulf %2, %2 : vector<512x128xf32>
    %cst_6 = arith.constant dense<0.000000e+00> : vector<128xf32>
    %7 = vector.multi_reduction <add>, %6, %cst_6 [0] : vector<512x128xf32> to vector<128xf32>
    %8 = vector.shape_cast %7 : vector<128xf32> to vector<1x128xf32>
    %cst_7 = arith.constant 0.000000e+00 : f32
    %9 = vector.broadcast %cst_7 : f32 to vector<6x128xf32>
    %10 = tpu.concatenate %5, %8, %9 in 0 : vector<1x128xf32>, vector<1x128xf32>, vector<6x128xf32> -> vector<8x128xf32>
    %c0_8 = arith.constant 0 : index
    %c0_9 = arith.constant 0 : index
    %11 = vector.load %arg4[%c0_8, %c0_9] : memref<8x128xf32, #tpu.memory_space<vmem>>, vector<8x128xf32>
    tpu.vector_store %arg4[%c0_8, %c0_9], %10 {strides = array<i32>} : memref<8x128xf32, #tpu.memory_space<vmem>>, vector<8x128xf32>,
    return
  }
  func.func @transform_0(%arg0: i32) -> (i32, i32) {
    %c0_i32 = arith.constant 0 : i32
    %c0_i32_0 = arith.constant 0 : i32
    return %arg0, %c0_i32 : i32, i32
  }
  func.func @transform_1(%arg0: i32) -> (i32, i32) {
    %c0_i32 = arith.constant 0 : i32
    %c0_i32_0 = arith.constant 0 : i32
    %c0_i32_1 = arith.constant 0 : i32
    return %c0_i32, %c0_i32_0 : i32, i32
  }
  func.func @transform_2(%arg0: i32) -> (i32, i32) {
    %c0_i32 = arith.constant 0 : i32
    %c0_i32_0 = arith.constant 0 : i32
    return %arg0, %c0_i32 : i32, i32
  }
  func.func @transform_3(%arg0: i32) -> (i32, i32) {
    %c0_i32 = arith.constant 0 : i32
    %c0_i32_0 = arith.constant 0 : i32
    return %arg0, %c0_i32 : i32, i32
  }
}

module attributes {stable_mosaic.version = 11 : i64} {
  func.func @_bn_relu_kernel(%arg0: i32, %arg1: memref<512x128xf32, #tpu.memory_space<vmem>>, %arg2: memref<8x128xf32, #tpu.memory_space<vmem>>, %arg3: memref<512x128xf32, #tpu.memory_space<vmem>>) attributes {dimension_semantics = [#tpu.dimension_semantics<parallel>], iteration_bounds = array<i64: 1>, scalar_prefetch = 0 : i64, scratch_operands = 0 : i64, tpu.core_type = #tpu.core_type<tc>, window_params = [{transform_indices = @transform_0, window_bounds = array<i64: 512, 128>}, {pipeline_mode = #tpu.pipeline_mode<synchronous>, transform_indices = @transform_1, window_bounds = array<i64: 8, 128>}, {transform_indices = @transform_2, window_bounds = array<i64: 512, 128>}]} {
    %c0 = arith.constant 0 : index
    %c0_0 = arith.constant 0 : index
    %0 = vector.load %arg2[%c0, %c0_0] : memref<8x128xf32, #tpu.memory_space<vmem>>, vector<1x128xf32>
    %c1 = arith.constant 1 : index
    %c0_1 = arith.constant 0 : index
    %1 = vector.load %arg2[%c1, %c0_1] : memref<8x128xf32, #tpu.memory_space<vmem>>, vector<1x128xf32>
    %c0_2 = arith.constant 0 : index
    %c0_3 = arith.constant 0 : index
    %2 = vector.load %arg1[%c0_2, %c0_3] : memref<512x128xf32, #tpu.memory_space<vmem>>, vector<512x128xf32>
    %3 = vector.broadcast %0 : vector<1x128xf32> to vector<512x128xf32>
    %4 = arith.mulf %2, %3 : vector<512x128xf32>
    %5 = vector.broadcast %1 : vector<1x128xf32> to vector<512x128xf32>
    %6 = arith.addf %4, %5 : vector<512x128xf32>
    %cst = arith.constant 0.000000e+00 : f32
    %7 = vector.broadcast %cst : f32 to vector<512x128xf32>
    %8 = arith.maximumf %6, %7 : vector<512x128xf32>
    %c0_4 = arith.constant 0 : index
    %c0_5 = arith.constant 0 : index
    %9 = vector.load %arg3[%c0_4, %c0_5] : memref<512x128xf32, #tpu.memory_space<vmem>>, vector<512x128xf32>
    tpu.vector_store %arg3[%c0_4, %c0_5], %8 {strides = array<i32>} : memref<512x128xf32, #tpu.memory_space<vmem>>, vector<512x128xf32>,
    return
  }
  func.func @transform_0(%arg0: i32) -> (i32, i32) {
    %c0_i32 = arith.constant 0 : i32
    %c0_i32_0 = arith.constant 0 : i32
    return %arg0, %c0_i32 : i32, i32
  }
  func.func @transform_1(%arg0: i32) -> (i32, i32) {
    %c0_i32 = arith.constant 0 : i32
    %c0_i32_0 = arith.constant 0 : i32
    %c0_i32_1 = arith.constant 0 : i32
    return %c0_i32, %c0_i32_0 : i32, i32
  }
  func.func @transform_2(%arg0: i32) -> (i32, i32) {
    %c0_i32 = arith.constant 0 : i32
    %c0_i32_0 = arith.constant 0 : i32
    return %arg0, %c0_i32 : i32, i32
  }
}

</mosaic_0001>

<bundles_post_ra>
// kernel: basic_conv2d.3
= control target key start
LH: loop header
LB: loop body
LE: loop exit
PB: predicated region body
PF: predicated region fallthrough
CT: control target
= control target key end

     0   :  { %s884_s0 = inlined_call_operand.vmem [shape: f32[512,128], index: 0, kind: input, shape index: {}, may-alias: {0,2}]   ;;  %s885_s1 = inlined_call_operand.vmem [shape: f32[8,128], index: 1, kind: input, shape index: {}]   ;;  %s886_s2 = inlined_call_operand.vmem [shape: f32[512,128], index: 2, kind: output, shape index: {}, may-alias: {0,2}]  }
   0x1   :  { %v365_v0 = vld [vmem:[%s885_s1] ss:$0 sm:$0xff]  ;;  %v370_v1 = vld [vmem:[%s885_s1 + $0x1] ss:$0 sm:$0xff]  ;;  %v14_v4 = vld [vmem:[%s884_s0 + $0x8] sm:$0xff] }
   0x2   :  { %v13_v2 = vld [vmem:[%s884_s0] sm:$0xff]  ;;  %v15_v5 = vld [vmem:[%s884_s0 + $0x10] sm:$0xff]  ;;  %v16_v6 = vld [vmem:[%s884_s0 + $0x18] sm:$0xff]  ;;  %v82_v7 = vmul.f32 %v365_v0, %v14_v4 }
   0x3   :  { %v81_v3 = vmul.f32 %v365_v0, %v13_v2  ;;  %v83_v8 = vmul.f32 %v365_v0, %v15_v5  ;;  %v84_v9 = vmul.f32 %v365_v0, %v16_v6  ;;  %v17_v10 = vld [vmem:[%s884_s0 + $0x20] sm:$0xff]  ;;  %v18_v11 = vld [vmem:[%s884_s0 + $0x28] sm:$0xff]  ;;  %v19_v12 = vld [vmem:[%s884_s0 + $0x30] sm:$0xff] }
   0x4   :  { %v85_v14 = vmul.f32 %v365_v0, %v17_v10  ;;  %v86_v15 = vmul.f32 %v365_v0, %v18_v11  ;;  %v87_v16 = vmul.f32 %v365_v0, %v19_v12  ;;  %v20_v17 = vld [vmem:[%s884_s0 + $0x38] sm:$0xff]  ;;  %v150_v18 = vadd.f32 %v370_v1, %v82_v7  ;;  %v21_v22 = vld [vmem:[%s884_s0 + $0x40] sm:$0xff]  ;;  %v22_v27 = vld [vmem:[%s884_s0 + $0x48] sm:$0xff] }
   0x5   :  { %v149_v13 = vadd.f32 %v370_v1, %v81_v3  ;;  %v151_v19 = vadd.f32 %v370_v1, %v83_v8  ;;  %v152_v20 = vadd.f32 %v370_v1, %v84_v9  ;;  %v88_v21 = vmul.f32 %v365_v0, %v20_v17  ;;  %v23_v28 = vld [vmem:[%s884_s0 + $0x50] sm:$0xff]  ;;  %v24_v29 = vld [vmem:[%s884_s0 + $0x58] sm:$0xff]  ;;  %v25_v34 = vld [vmem:[%s884_s0 + $0x60] sm:$0xff] }
   0x6   :  { %v153_v24 = vadd.f32 %v370_v1, %v85_v14  ;;  %v154_v25 = vadd.f32 %v370_v1, %v86_v15  ;;  %v155_v26 = vadd.f32 %v370_v1, %v87_v16  ;;  %v214_v30 = vmax.f32 %v150_v18, 0.0  ;;  %v26_v35 = vld [vmem:[%s884_s0 + $0x68] sm:$0xff]  ;;  %v27_v36 = vld [vmem:[%s884_s0 + $0x70] sm:$0xff] }
   0x7   :  { %v213_v23 = vmax.f32 %v149_v13, 0.0  ;;  %v215_v31 = vmax.f32 %v151_v19, 0.0  ;;  %v216_v32 = vmax.f32 %v152_v20, 0.0  ;;  %v156_v33 = vadd.f32 %v370_v1, %v88_v21 }
   0x8   :  { %v217_v37 = vmax.f32 %v153_v24, 0.0  ;;  %v218_v38 = vmax.f32 %v154_v25, 0.0  ;;  %v219_v39 = vmax.f32 %v155_v26, 0.0  ;;  %v89_v40 = vmul.f32 %v365_v0, %v21_v22 }
   0x9   :  { %277 = vst [vmem:[%s886_s2] sm:$0xff] %v213_v23  ;;  %v220_v42 = vmax.f32 %v156_v33, 0.0  ;;  %v90_v43 = vmul.f32 %v365_v0, %v22_v27  ;;  %v91_v44 = vmul.f32 %v365_v0, %v23_v28  ;;  %v92_v45 = vmul.f32 %v365_v0, %v24_v29 }
   0xa   :  { %v157_v46 = vadd.f32 %v370_v1, %v89_v40  ;;  %v93_v47 = vmul.f32 %v365_v0, %v25_v34  ;;  %v94_v48 = vmul.f32 %v365_v0, %v26_v35  ;;  %v95_v49 = vmul.f32 %v365_v0, %v27_v36 }
   0xb   :  { %v158_v50 = vadd.f32 %v370_v1, %v90_v43  ;;  %v159_v51 = vadd.f32 %v370_v1, %v91_v44  ;;  %v160_v52 = vadd.f32 %v370_v1, %v92_v45 }
   0xc   :  { %v221_v55 = vmax.f32 %v157_v46, 0.0  ;;  %v161_v56 = vadd.f32 %v370_v1, %v93_v47  ;;  %v162_v57 = vadd.f32 %v370_v1, %v94_v48  ;;  %v163_v58 = vadd.f32 %v370_v1, %v95_v49 }
   0xd   :  { %v222_v62 = vmax.f32 %v158_v50, 0.0  ;;  %v223_v63 = vmax.f32 %v159_v51, 0.0  ;;  %v224_v2 = vmax.f32 %v160_v52, 0.0 }
   0xe   :  { %v225_v7 = vmax.f32 %v161_v56, 0.0  ;;  %v226_v8 = vmax.f32 %v162_v57, 0.0  ;;  %v227_v9 = vmax.f32 %v163_v58, 0.0 }
  0x10   :  { %v28_v41 = vld [vmem:[%s884_s0 + $0x78] sm:$0xff] }
  0x11   :  { %278 = vst [vmem:[%s886_s2 + $0x8] sm:$0xff] %v214_v30  ;;  %279 = vst [vmem:[%s886_s2 + $0x10] sm:$0xff] %v215_v31  ;;  %v96_v53 = vmul.f32 %v365_v0, %v28_v41 }
  0x12   :  { %280 = vst [vmem:[%s886_s2 + $0x18] sm:$0xff] %v216_v32  ;;  %281 = vst [vmem:[%s886_s2 + $0x20] sm:$0xff] %v217_v37 }
  0x13   :  { %282 = vst [vmem:[%s886_s2 + $0x28] sm:$0xff] %v218_v38  ;;  %283 = vst [vmem:[%s886_s2 + $0x30] sm:$0xff] %v219_v39  ;;  %v164_v3 = vadd.f32 %v370_v1, %v96_v53 }
  0x14   :  { %284 = vst [vmem:[%s886_s2 + $0x38] sm:$0xff] %v220_v42 }
  0x15   :  { %v228_v12 = vmax.f32 %v164_v3, 0.0 }
  0x1b   :  { %v29_v54 = vld [vmem:[%s884_s0 + $0x80] sm:$0xff]  ;;  %v30_v59 = vld [vmem:[%s884_s0 + $0x88] sm:$0xff]  ;;  %v31_v60 = vld [vmem:[%s884_s0 + $0x90] sm:$0xff] }
  0x1c   :  { %v32_v61 = vld [vmem:[%s884_s0 + $0x98] sm:$0xff]  ;;  %v33_v4 = vld [vmem:[%s884_s0 + $0xa0] sm:$0xff]  ;;  %v34_v5 = vld [vmem:[%s884_s0 + $0xa8] sm:$0xff]  ;;  %v97_v10 = vmul.f32 %v365_v0, %v29_v54  ;;  %v98_v13 = vmul.f32 %v365_v0, %v30_v59  ;;  %v99_v14 = vmul.f32 %v365_v0, %v31_v60 }
  0x1d   :  { %v35_v6 = vld [vmem:[%s884_s0 + $0xb0] sm:$0xff]  ;;  %v100_v15 = vmul.f32 %v365_v0, %v32_v61  ;;  %v101_v17 = vmul.f32 %v365_v0, %v33_v4  ;;  %v102_v18 = vmul.f32 %v365_v0, %v34_v5 }
  0x1e   :  { %285 = vst [vmem:[%s886_s2 + $0x40] sm:$0xff] %v221_v55  ;;  %v165_v16 = vadd.f32 %v370_v1, %v97_v10  ;;  %v103_v19 = vmul.f32 %v365_v0, %v35_v6  ;;  %v166_v20 = vadd.f32 %v370_v1, %v98_v13  ;;  %v167_v21 = vadd.f32 %v370_v1, %v99_v14 }
  0x1f   :  { %v168_v22 = vadd.f32 %v370_v1, %v100_v15  ;;  %v169_v26 = vadd.f32 %v370_v1, %v101_v17  ;;  %v170_v27 = vadd.f32 %v370_v1, %v102_v18 }
  0x20   :  { %v229_v25 = vmax.f32 %v165_v16, 0.0  ;;  %v171_v28 = vadd.f32 %v370_v1, %v103_v19  ;;  %v230_v32 = vmax.f32 %v166_v20, 0.0  ;;  %v231_v33 = vmax.f32 %v167_v21, 0.0 }
  0x21   :  { %v232_v34 = vmax.f32 %v168_v22, 0.0  ;;  %v233_v39 = vmax.f32 %v169_v26, 0.0  ;;  %v234_v40 = vmax.f32 %v170_v27, 0.0 }
  0x22   :  { %v235_v41 = vmax.f32 %v171_v28, 0.0 }
  0x25   :  { %v36_v11 = vld [vmem:[%s884_s0 + $0xb8] sm:$0xff] }
  0x26   :  { %286 = vst [vmem:[%s886_s2 + $0x48] sm:$0xff] %v222_v62  ;;  %287 = vst [vmem:[%s886_s2 + $0x50] sm:$0xff] %v223_v63  ;;  %v104_v23 = vmul.f32 %v365_v0, %v36_v11 }
  0x27   :  { %288 = vst [vmem:[%s886_s2 + $0x58] sm:$0xff] %v224_v2  ;;  %289 = vst [vmem:[%s886_s2 + $0x60] sm:$0xff] %v225_v7 }
  0x28   :  { %290 = vst [vmem:[%s886_s2 + $0x68] sm:$0xff] %v226_v8  ;;  %291 = vst [vmem:[%s886_s2 + $0x70] sm:$0xff] %v227_v9  ;;  %v172_v35 = vadd.f32 %v370_v1, %v104_v23 }
  0x29   :  { %292 = vst [vmem:[%s886_s2 + $0x78] sm:$0xff] %v228_v12 }
  0x2a   :  { %v236_v44 = vmax.f32 %v172_v35, 0.0 }
  0x30   :  { %v37_v24 = vld [vmem:[%s884_s0 + $0xc0] sm:$0xff]  ;;  %v38_v29 = vld [vmem:[%s884_s0 + $0xc8] sm:$0xff]  ;;  %v39_v30 = vld [vmem:[%s884_s0 + $0xd0] sm:$0xff] }
  0x31   :  { %v40_v31 = vld [vmem:[%s884_s0 + $0xd8] sm:$0xff]  ;;  %v41_v36 = vld [vmem:[%s884_s0 + $0xe0] sm:$0xff]  ;;  %v42_v37 = vld [vmem:[%s884_s0 + $0xe8] sm:$0xff]  ;;  %v105_v42 = vmul.f32 %v365_v0, %v37_v24  ;;  %v106_v45 = vmul.f32 %v365_v0, %v38_v29  ;;  %v107_v46 = vmul.f32 %v365_v0, %v39_v30 }
  0x32   :  { %v43_v38 = vld [vmem:[%s884_s0 + $0xf0] sm:$0xff]  ;;  %v108_v47 = vmul.f32 %v365_v0, %v40_v31  ;;  %v109_v49 = vmul.f32 %v365_v0, %v41_v36  ;;  %v110_v50 = vmul.f32 %v365_v0, %v42_v37 }
  0x33   :  { %293 = vst [vmem:[%s886_s2 + $0x80] sm:$0xff] %v229_v25  ;;  %v173_v48 = vadd.f32 %v370_v1, %v105_v42  ;;  %v111_v51 = vmul.f32 %v365_v0, %v43_v38  ;;  %v174_v52 = vadd.f32 %v370_v1, %v106_v45  ;;  %v175_v53 = vadd.f32 %v370_v1, %v107_v46 }
  0x34   :  { %v176_v54 = vadd.f32 %v370_v1, %v108_v47  ;;  %v177_v58 = vadd.f32 %v370_v1, %v109_v49  ;;  %v178_v59 = vadd.f32 %v370_v1, %v110_v50 }
  0x35   :  { %v237_v57 = vmax.f32 %v173_v48, 0.0  ;;  %v179_v60 = vadd.f32 %v370_v1, %v111_v51  ;;  %v238_v2 = vmax.f32 %v174_v52, 0.0  ;;  %v239_v3 = vmax.f32 %v175_v53, 0.0 }
  0x36   :  { %v240_v4 = vmax.f32 %v176_v54, 0.0  ;;  %v241_v9 = vmax.f32 %v177_v58, 0.0  ;;  %v242_v10 = vmax.f32 %v178_v59, 0.0 }
  0x37   :  { %v243_v11 = vmax.f32 %v179_v60, 0.0 }
  0x3a   :  { %v44_v43 = vld [vmem:[%s884_s0 + $0xf8] sm:$0xff] }
  0x3b   :  { %294 = vst [vmem:[%s886_s2 + $0x88] sm:$0xff] %v230_v32  ;;  %295 = vst [vmem:[%s886_s2 + $0x90] sm:$0xff] %v231_v33  ;;  %v112_v55 = vmul.f32 %v365_v0, %v44_v43 }
  0x3c   :  { %296 = vst [vmem:[%s886_s2 + $0x98] sm:$0xff] %v232_v34  ;;  %297 = vst [vmem:[%s886_s2 + $0xa0] sm:$0xff] %v233_v39 }
  0x3d   :  { %298 = vst [vmem:[%s886_s2 + $0xa8] sm:$0xff] %v234_v40  ;;  %299 = vst [vmem:[%s886_s2 + $0xb0] sm:$0xff] %v235_v41  ;;  %v180_v5 = vadd.f32 %v370_v1, %v112_v55 }
  0x3e   :  { %300 = vst [vmem:[%s886_s2 + $0xb8] sm:$0xff] %v236_v44 }
  0x3f   :  { %v244_v14 = vmax.f32 %v180_v5, 0.0 }
  0x45   :  { %v45_v56 = vld [vmem:[%s884_s0 + $0x100] sm:$0xff]  ;;  %v46_v61 = vld [vmem:[%s884_s0 + $0x108] sm:$0xff]  ;;  %v47_v62 = vld [vmem:[%s884_s0 + $0x110] sm:$0xff] }
  0x46   :  { %v48_v63 = vld [vmem:[%s884_s0 + $0x118] sm:$0xff]  ;;  %v49_v6 = vld [vmem:[%s884_s0 + $0x120] sm:$0xff]  ;;  %v50_v7 = vld [vmem:[%s884_s0 + $0x128] sm:$0xff]  ;;  %v113_v12 = vmul.f32 %v365_v0, %v45_v56  ;;  %v114_v15 = vmul.f32 %v365_v0, %v46_v61  ;;  %v115_v16 = vmul.f32 %v365_v0, %v47_v62 }
  0x47   :  { %v51_v8 = vld [vmem:[%s884_s0 + $0x130] sm:$0xff]  ;;  %v116_v17 = vmul.f32 %v365_v0, %v48_v63  ;;  %v117_v19 = vmul.f32 %v365_v0, %v49_v6  ;;  %v118_v20 = vmul.f32 %v365_v0, %v50_v7 }
  0x48   :  { %301 = vst [vmem:[%s886_s2 + $0xc0] sm:$0xff] %v237_v57  ;;  %v181_v18 = vadd.f32 %v370_v1, %v113_v12  ;;  %v119_v21 = vmul.f32 %v365_v0, %v51_v8  ;;  %v182_v22 = vadd.f32 %v370_v1, %v114_v15  ;;  %v183_v23 = vadd.f32 %v370_v1, %v115_v16 }
  0x49   :  { %v184_v24 = vadd.f32 %v370_v1, %v116_v17  ;;  %v185_v28 = vadd.f32 %v370_v1, %v117_v19  ;;  %v186_v29 = vadd.f32 %v370_v1, %v118_v20 }
  0x4a   :  { %v245_v27 = vmax.f32 %v181_v18, 0.0  ;;  %v187_v30 = vadd.f32 %v370_v1, %v119_v21  ;;  %v246_v34 = vmax.f32 %v182_v22, 0.0  ;;  %v247_v35 = vmax.f32 %v183_v23, 0.0 }
  0x4b   :  { %v248_v36 = vmax.f32 %v184_v24, 0.0  ;;  %v249_v41 = vmax.f32 %v185_v28, 0.0  ;;  %v250_v42 = vmax.f32 %v186_v29, 0.0 }
  0x4c   :  { %v251_v43 = vmax.f32 %v187_v30, 0.0 }
  0x4f   :  { %v52_v13 = vld [vmem:[%s884_s0 + $0x138] sm:$0xff] }
  0x50   :  { %302 = vst [vmem:[%s886_s2 + $0xc8] sm:$0xff] %v238_v2  ;;  %303 = vst [vmem:[%s886_s2 + $0xd0] sm:$0xff] %v239_v3  ;;  %v120_v25 = vmul.f32 %v365_v0, %v52_v13 }
  0x51   :  { %304 = vst [vmem:[%s886_s2 + $0xd8] sm:$0xff] %v240_v4  ;;  %305 = vst [vmem:[%s886_s2 + $0xe0] sm:$0xff] %v241_v9 }
  0x52   :  { %306 = vst [vmem:[%s886_s2 + $0xe8] sm:$0xff] %v242_v10  ;;  %307 = vst [vmem:[%s886_s2 + $0xf0] sm:$0xff] %v243_v11  ;;  %v188_v37 = vadd.f32 %v370_v1, %v120_v25 }
  0x53   :  { %308 = vst [vmem:[%s886_s2 + $0xf8] sm:$0xff] %v244_v14 }
  0x54   :  { %v252_v46 = vmax.f32 %v188_v37, 0.0 }
  0x5a   :  { %v53_v26 = vld [vmem:[%s884_s0 + $0x140] sm:$0xff]  ;;  %v54_v31 = vld [vmem:[%s884_s0 + $0x148] sm:$0xff]  ;;  %v55_v32 = vld [vmem:[%s884_s0 + $0x150] sm:$0xff] }
  0x5b   :  { %v56_v33 = vld [vmem:[%s884_s0 + $0x158] sm:$0xff]  ;;  %v57_v38 = vld [vmem:[%s884_s0 + $0x160] sm:$0xff]  ;;  %v58_v39 = vld [vmem:[%s884_s0 + $0x168] sm:$0xff]  ;;  %v121_v44 = vmul.f32 %v365_v0, %v53_v26  ;;  %v122_v47 = vmul.f32 %v365_v0, %v54_v31  ;;  %v123_v48 = vmul.f32 %v365_v0, %v55_v32 }
  0x5c   :  { %v59_v40 = vld [vmem:[%s884_s0 + $0x170] sm:$0xff]  ;;  %v124_v49 = vmul.f32 %v365_v0, %v56_v33  ;;  %v125_v51 = vmul.f32 %v365_v0, %v57_v38  ;;  %v126_v52 = vmul.f32 %v365_v0, %v58_v39 }
  0x5d   :  { %309 = vst [vmem:[%s886_s2 + $0x100] sm:$0xff] %v245_v27  ;;  %v189_v50 = vadd.f32 %v370_v1, %v121_v44  ;;  %v127_v53 = vmul.f32 %v365_v0, %v59_v40  ;;  %v190_v54 = vadd.f32 %v370_v1, %v122_v47  ;;  %v191_v55 = vadd.f32 %v370_v1, %v123_v48 }
  0x5e   :  { %v192_v56 = vadd.f32 %v370_v1, %v124_v49  ;;  %v193_v60 = vadd.f32 %v370_v1, %v125_v51  ;;  %v194_v61 = vadd.f32 %v370_v1, %v126_v52 }
  0x5f   :  { %v253_v59 = vmax.f32 %v189_v50, 0.0  ;;  %v195_v62 = vadd.f32 %v370_v1, %v127_v53  ;;  %v254_v4 = vmax.f32 %v190_v54, 0.0  ;;  %v255_v5 = vmax.f32 %v191_v55, 0.0 }
  0x60   :  { %v256_v6 = vmax.f32 %v192_v56, 0.0  ;;  %v257_v11 = vmax.f32 %v193_v60, 0.0  ;;  %v258_v12 = vmax.f32 %v194_v61, 0.0 }
  0x61   :  { %v259_v13 = vmax.f32 %v195_v62, 0.0 }
  0x64   :  { %v60_v45 = vld [vmem:[%s884_s0 + $0x178] sm:$0xff] }
  0x65   :  { %310 = vst [vmem:[%s886_s2 + $0x108] sm:$0xff] %v246_v34  ;;  %311 = vst [vmem:[%s886_s2 + $0x110] sm:$0xff] %v247_v35  ;;  %v128_v57 = vmul.f32 %v365_v0, %v60_v45 }
  0x66   :  { %312 = vst [vmem:[%s886_s2 + $0x118] sm:$0xff] %v248_v36  ;;  %313 = vst [vmem:[%s886_s2 + $0x120] sm:$0xff] %v249_v41 }
  0x67   :  { %314 = vst [vmem:[%s886_s2 + $0x128] sm:$0xff] %v250_v42  ;;  %315 = vst [vmem:[%s886_s2 + $0x130] sm:$0xff] %v251_v43  ;;  %v196_v7 = vadd.f32 %v370_v1, %v128_v57 }
  0x68   :  { %316 = vst [vmem:[%s886_s2 + $0x138] sm:$0xff] %v252_v46 }
  0x69   :  { %v260_v16 = vmax.f32 %v196_v7, 0.0 }
  0x6f   :  { %v61_v58 = vld [vmem:[%s884_s0 + $0x180] sm:$0xff]  ;;  %v62_v63 = vld [vmem:[%s884_s0 + $0x188] sm:$0xff]  ;;  %v63_v2 = vld [vmem:[%s884_s0 + $0x190] sm:$0xff] }
  0x70   :  { %v64_v3 = vld [vmem:[%s884_s0 + $0x198] sm:$0xff]  ;;  %v65_v8 = vld [vmem:[%s884_s0 + $0x1a0] sm:$0xff]  ;;  %v66_v9 = vld [vmem:[%s884_s0 + $0x1a8] sm:$0xff]  ;;  %v129_v14 = vmul.f32 %v365_v0, %v61_v58  ;;  %v130_v17 = vmul.f32 %v365_v0, %v62_v63  ;;  %v131_v18 = vmul.f32 %v365_v0, %v63_v2 }
  0x71   :  { %v67_v10 = vld [vmem:[%s884_s0 + $0x1b0] sm:$0xff]  ;;  %v132_v19 = vmul.f32 %v365_v0, %v64_v3  ;;  %v133_v21 = vmul.f32 %v365_v0, %v65_v8  ;;  %v134_v22 = vmul.f32 %v365_v0, %v66_v9 }
  0x72   :  { %317 = vst [vmem:[%s886_s2 + $0x140] sm:$0xff] %v253_v59  ;;  %v197_v20 = vadd.f32 %v370_v1, %v129_v14  ;;  %v135_v23 = vmul.f32 %v365_v0, %v67_v10  ;;  %v198_v24 = vadd.f32 %v370_v1, %v130_v17  ;;  %v199_v25 = vadd.f32 %v370_v1, %v131_v18 }
  0x73   :  { %v200_v26 = vadd.f32 %v370_v1, %v132_v19  ;;  %v201_v30 = vadd.f32 %v370_v1, %v133_v21  ;;  %v202_v31 = vadd.f32 %v370_v1, %v134_v22 }
  0x74   :  { %v261_v29 = vmax.f32 %v197_v20, 0.0  ;;  %v203_v32 = vadd.f32 %v370_v1, %v135_v23  ;;  %v262_v36 = vmax.f32 %v198_v24, 0.0  ;;  %v263_v37 = vmax.f32 %v199_v25, 0.0 }
  0x75   :  { %v264_v38 = vmax.f32 %v200_v26, 0.0  ;;  %v265_v43 = vmax.f32 %v201_v30, 0.0  ;;  %v266_v44 = vmax.f32 %v202_v31, 0.0 }
  0x76   :  { %v267_v45 = vmax.f32 %v203_v32, 0.0 }
  0x79   :  { %v68_v15 = vld [vmem:[%s884_s0 + $0x1b8] sm:$0xff] }
  0x7a   :  { %318 = vst [vmem:[%s886_s2 + $0x148] sm:$0xff] %v254_v4  ;;  %319 = vst [vmem:[%s886_s2 + $0x150] sm:$0xff] %v255_v5  ;;  %v136_v27 = vmul.f32 %v365_v0, %v68_v15 }
  0x7b   :  { %320 = vst [vmem:[%s886_s2 + $0x158] sm:$0xff] %v256_v6  ;;  %321 = vst [vmem:[%s886_s2 + $0x160] sm:$0xff] %v257_v11 }
  0x7c   :  { %322 = vst [vmem:[%s886_s2 + $0x168] sm:$0xff] %v258_v12  ;;  %323 = vst [vmem:[%s886_s2 + $0x170] sm:$0xff] %v259_v13  ;;  %v204_v39 = vadd.f32 %v370_v1, %v136_v27 }
  0x7d   :  { %324 = vst [vmem:[%s886_s2 + $0x178] sm:$0xff] %v260_v16 }
  0x7e   :  { %v268_v48 = vmax.f32 %v204_v39, 0.0 }
  0x84   :  { %v69_v28 = vld [vmem:[%s884_s0 + $0x1c0] sm:$0xff]  ;;  %v70_v33 = vld [vmem:[%s884_s0 + $0x1c8] sm:$0xff]  ;;  %v71_v34 = vld [vmem:[%s884_s0 + $0x1d0] sm:$0xff] }
  0x85   :  { %v72_v35 = vld [vmem:[%s884_s0 + $0x1d8] sm:$0xff]  ;;  %v73_v40 = vld [vmem:[%s884_s0 + $0x1e0] sm:$0xff]  ;;  %v74_v41 = vld [vmem:[%s884_s0 + $0x1e8] sm:$0xff]  ;;  %v137_v46 = vmul.f32 %v365_v0, %v69_v28  ;;  %v138_v49 = vmul.f32 %v365_v0, %v70_v33  ;;  %v139_v50 = vmul.f32 %v365_v0, %v71_v34 }
  0x86   :  { %v75_v42 = vld [vmem:[%s884_s0 + $0x1f0] sm:$0xff]  ;;  %v140_v51 = vmul.f32 %v365_v0, %v72_v35  ;;  %v141_v53 = vmul.f32 %v365_v0, %v73_v40  ;;  %v142_v54 = vmul.f32 %v365_v0, %v74_v41 }
  0x87   :  { %325 = vst [vmem:[%s886_s2 + $0x180] sm:$0xff] %v261_v29  ;;  %v205_v52 = vadd.f32 %v370_v1, %v137_v46  ;;  %v143_v55 = vmul.f32 %v365_v0, %v75_v42  ;;  %v206_v56 = vadd.f32 %v370_v1, %v138_v49  ;;  %v207_v57 = vadd.f32 %v370_v1, %v139_v50 }
  0x88   :  { %v208_v58 = vadd.f32 %v370_v1, %v140_v51  ;;  %v209_v61 = vadd.f32 %v370_v1, %v141_v53  ;;  %v210_v62 = vadd.f32 %v370_v1, %v142_v54 }
  0x89   :  { %v269_v60 = vmax.f32 %v205_v52, 0.0  ;;  %v211_v63 = vadd.f32 %v370_v1, %v143_v55  ;;  %v270_v2 = vmax.f32 %v206_v56, 0.0  ;;  %v271_v3 = vmax.f32 %v207_v57, 0.0 }
  0x8a   :  { %v272_v4 = vmax.f32 %v208_v58, 0.0  ;;  %v273_v6 = vmax.f32 %v209_v61, 0.0  ;;  %v274_v7 = vmax.f32 %v210_v62, 0.0 }
  0x8b   :  { %v275_v8 = vmax.f32 %v211_v63, 0.0 }
  0x8e   :  { %v76_v47 = vld [vmem:[%s884_s0 + $0x1f8] sm:$0xff] }
  0x8f   :  { %326 = vst [vmem:[%s886_s2 + $0x188] sm:$0xff] %v262_v36  ;;  %327 = vst [vmem:[%s886_s2 + $0x190] sm:$0xff] %v263_v37  ;;  %v144_v59 = vmul.f32 %v365_v0, %v76_v47 }
  0x90   :  { %328 = vst [vmem:[%s886_s2 + $0x198] sm:$0xff] %v264_v38  ;;  %329 = vst [vmem:[%s886_s2 + $0x1a0] sm:$0xff] %v265_v43 }
  0x91   :  { %330 = vst [vmem:[%s886_s2 + $0x1a8] sm:$0xff] %v266_v44  ;;  %331 = vst [vmem:[%s886_s2 + $0x1b0] sm:$0xff] %v267_v45  ;;  %v212_v5 = vadd.f32 %v370_v1, %v144_v59 }
  0x92   :  { %332 = vst [vmem:[%s886_s2 + $0x1b8] sm:$0xff] %v268_v48  ;;  %333 = vst [vmem:[%s886_s2 + $0x1c0] sm:$0xff] %v269_v60 }
  0x93   :  { %334 = vst [vmem:[%s886_s2 + $0x1c8] sm:$0xff] %v270_v2  ;;  %335 = vst [vmem:[%s886_s2 + $0x1d0] sm:$0xff] %v271_v3  ;;  %v276_v0 = vmax.f32 %v212_v5, 0.0 }
  0x94   :  { %336 = vst [vmem:[%s886_s2 + $0x1d8] sm:$0xff] %v272_v4  ;;  %337 = vst [vmem:[%s886_s2 + $0x1e0] sm:$0xff] %v273_v6 }
  0x95   :  { %338 = vst [vmem:[%s886_s2 + $0x1e8] sm:$0xff] %v274_v7  ;;  %339 = vst [vmem:[%s886_s2 + $0x1f0] sm:$0xff] %v275_v8 }
  0x96   :  { %340 = vst [vmem:[%s886_s2 + $0x1f8] sm:$0xff] %v276_v0 }

// kernel: basic_conv2d.2
= control target key start
LH: loop header
LB: loop body
LE: loop exit
PB: predicated region body
PF: predicated region fallthrough
CT: control target
= control target key end

     0   :  { %vm744_vm0 = vcmask 1040384   ;;  %vm746_vm1 = vcmask 1041408   ;;  %s1644_s1 = inlined_call_operand.vmem [shape: f32[128,128], index: 1, kind: input, shape index: {}]   ;;  %s1645_s0 = inlined_call_operand.vmem [shape: f32[512,128], index: 0, kind: input, shape index: {}]   ;;  %s1646_s2 = inlined_call_operand.vmem [shape: f32[512,128], index: 2, kind: output, shape index: {0}]   ;;  %s1647_s3 = inlined_call_operand.vmem [shape: f32[8,128], index: 3, kind: output, shape index: {1}]  }
   0x1   :  { %v92_v0 = vld [vmem:[%s1644_s1 + $0x78] sm:$0xff]  ;;  %v91_v1 = vld [vmem:[%s1644_s1 + $0x70] sm:$0xff]  ;;  %v90_v2 = vld [vmem:[%s1644_s1 + $0x68] sm:$0xff] }
   0x2   :  { %837 = vmatprep.subr.mxu0 %v92_v0  ;;  %965 = vmatprep.subr.mxu1 %v92_v0  ;;  %v89_v3 = vld [vmem:[%s1644_s1 + $0x60] sm:$0xff]  ;;  %v88_v5 = vld [vmem:[%s1644_s1 + $0x58] sm:$0xff]  ;;  %v87_v6 = vld [vmem:[%s1644_s1 + $0x50] sm:$0xff] }
   0x3   :  { %838 = vmatpush3.msra.mxu0 %v92_v0  ;;  %981 = vmatpush3.msra.mxu1 %v92_v0  ;;  %v13_v4 = vld [vmem:[%s1645_s0] sm:$0xff]  ;;  %v86_v7 = vld [vmem:[%s1644_s1 + $0x48] sm:$0xff]  ;;  %v84_v9 = vld [vmem:[%s1644_s1 + $0x38] sm:$0xff] }
   0x4   :  { %839 = vmatprep.subr.mxu0 %v91_v1  ;;  %966 = vmatprep.subr.mxu1 %v91_v1  ;;  %v85_v8 = vld [vmem:[%s1644_s1 + $0x40] sm:$0xff]  ;;  %v83_v10 = vld [vmem:[%s1644_s1 + $0x30] sm:$0xff]  ;;  %v82_v11 = vld [vmem:[%s1644_s1 + $0x28] sm:$0xff] }
   0x5   :  { %840 = vmatpush3.msra.mxu0 %v91_v1  ;;  %982 = vmatpush3.msra.mxu1 %v91_v1  ;;  %v81_v12 = vld [vmem:[%s1644_s1 + $0x20] sm:$0xff]  ;;  %v80_v13 = vld [vmem:[%s1644_s1 + $0x18] sm:$0xff]  ;;  %v79_v14 = vld [vmem:[%s1644_s1 + $0x10] sm:$0xff] }
   0x6   :  { %841 = vmatprep.subr.mxu0 %v90_v2  ;;  %967 = vmatprep.subr.mxu1 %v90_v2  ;;  %v78_v15 = vld [vmem:[%s1644_s1 + $0x8] sm:$0xff]  ;;  %v77_v16 = vld [vmem:[%s1644_s1] sm:$0xff]  ;;  %v15_v18 = vld [vmem:[%s1645_s0 + $0x10] sm:$0xff] }
   0x7   :  { %842 = vmatpush3.msra.mxu0 %v90_v2  ;;  %869 = vmatprep.mubr.f32.mxu0 %v13_v4  ;;  %v14_v17 = vld [vmem:[%s1645_s0 + $0x8] sm:$0xff]  ;;  %v45_v19 = vld [vmem:[%s1645_s0 + $0x100] sm:$0xff]  ;;  %v47_v21 = vld [vmem:[%s1645_s0 + $0x110] sm:$0xff] }
   0x8   :  { %843 = vmatprep.subr.mxu0 %v89_v3  ;;  %983 = vmatpush3.msra.mxu1 %v90_v2  ;;  %v46_v20 = vld [vmem:[%s1645_s0 + $0x108] sm:$0xff]  ;;  %v16_v22 = vld [vmem:[%s1645_s0 + $0x18] sm:$0xff]  ;;  %v17_v23 = vld [vmem:[%s1645_s0 + $0x20] sm:$0xff] }
   0x9   :  { %844 = vmatpush3.msra.mxu0 %v89_v3  ;;  %968 = vmatprep.subr.mxu1 %v89_v3  ;;  %v48_v24 = vld [vmem:[%s1645_s0 + $0x118] sm:$0xff]  ;;  %v49_v25 = vld [vmem:[%s1645_s0 + $0x120] sm:$0xff]  ;;  %v18_v26 = vld [vmem:[%s1645_s0 + $0x28] sm:$0xff] }
   0xa   :  { %845 = vmatprep.subr.mxu0 %v88_v5  ;;  %984 = vmatpush3.msra.mxu1 %v89_v3  ;;  %v19_v27 = vld [vmem:[%s1645_s0 + $0x30] sm:$0xff]  ;;  %v50_v28 = vld [vmem:[%s1645_s0 + $0x128] sm:$0xff]  ;;  %v20_v30 = vld [vmem:[%s1645_s0 + $0x38] sm:$0xff] }
   0xb   :  { %846 = vmatpush3.msra.mxu0 %v88_v5  ;;  %969 = vmatprep.subr.mxu1 %v88_v5  ;;  %v51_v29 = vld [vmem:[%s1645_s0 + $0x130] sm:$0xff]  ;;  %v21_v31 = vld [vmem:[%s1645_s0 + $0x40] sm:$0xff]  ;;  %v52_v32 = vld [vmem:[%s1645_s0 + $0x138] sm:$0xff] }
   0xc   :  { %847 = vmatprep.subr.mxu0 %v87_v6  ;;  %985 = vmatpush3.msra.mxu1 %v88_v5  ;;  %v53_v33 = vld [vmem:[%s1645_s0 + $0x140] sm:$0xff]  ;;  %v22_v34 = vld [vmem:[%s1645_s0 + $0x48] sm:$0xff]  ;;  %v23_v35 = vld [vmem:[%s1645_s0 + $0x50] sm:$0xff] }
   0xd   :  { %848 = vmatpush3.msra.mxu0 %v87_v6  ;;  %970 = vmatprep.subr.mxu1 %v87_v6  ;;  %v54_v36 = vld [vmem:[%s1645_s0 + $0x148] sm:$0xff]  ;;  %v55_v37 = vld [vmem:[%s1645_s0 + $0x150] sm:$0xff]  ;;  %v24_v38 = vld [vmem:[%s1645_s0 + $0x58] sm:$0xff] }
   0xe   :  { %849 = vmatprep.subr.mxu0 %v86_v7  ;;  %986 = vmatpush3.msra.mxu1 %v87_v6  ;;  %v25_v39 = vld [vmem:[%s1645_s0 + $0x60] sm:$0xff]  ;;  %v56_v40 = vld [vmem:[%s1645_s0 + $0x158] sm:$0xff]  ;;  %v26_v42 = vld [vmem:[%s1645_s0 + $0x68] sm:$0xff] }
   0xf   :  { %850 = vmatpush3.msra.mxu0 %v86_v7  ;;  %971 = vmatprep.subr.mxu1 %v86_v7  ;;  %v57_v41 = vld [vmem:[%s1645_s0 + $0x160] sm:$0xff]  ;;  %v27_v43 = vld [vmem:[%s1645_s0 + $0x70] sm:$0xff]  ;;  %v58_v44 = vld [vmem:[%s1645_s0 + $0x168] sm:$0xff] }
  0x10   :  { %851 = vmatprep.subr.mxu0 %v85_v8  ;;  %987 = vmatpush3.msra.mxu1 %v86_v7  ;;  %v59_v45 = vld [vmem:[%s1645_s0 + $0x170] sm:$0xff]  ;;  %v28_v46 = vld [vmem:[%s1645_s0 + $0x78] sm:$0xff]  ;;  %v29_v47 = vld [vmem:[%s1645_s0 + $0x80] sm:$0xff] }
  0x11   :  { %852 = vmatpush3.msra.mxu0 %v85_v8  ;;  %972 = vmatprep.subr.mxu1 %v85_v8  ;;  %v60_v48 = vld [vmem:[%s1645_s0 + $0x178] sm:$0xff]  ;;  %v61_v49 = vld [vmem:[%s1645_s0 + $0x180] sm:$0xff]  ;;  %v30_v50 = vld [vmem:[%s1645_s0 + $0x88] sm:$0xff] }
  0x12   :  { %853 = vmatprep.subr.mxu0 %v84_v9  ;;  %988 = vmatpush3.msra.mxu1 %v85_v8  ;;  %v31_v51 = vld [vmem:[%s1645_s0 + $0x90] sm:$0xff]  ;;  %v62_v52 = vld [vmem:[%s1645_s0 + $0x188] sm:$0xff]  ;;  %v32_v54 = vld [vmem:[%s1645_s0 + $0x98] sm:$0xff] }
  0x13   :  { %854 = vmatpush3.msra.mxu0 %v84_v9  ;;  %973 = vmatprep.subr.mxu1 %v84_v9  ;;  %v63_v53 = vld [vmem:[%s1645_s0 + $0x190] sm:$0xff]  ;;  %v33_v55 = vld [vmem:[%s1645_s0 + $0xa0] sm:$0xff]  ;;  %v64_v56 = vld [vmem:[%s1645_s0 + $0x198] sm:$0xff] }
  0x14   :  { %855 = vmatprep.subr.mxu0 %v83_v10  ;;  %989 = vmatpush3.msra.mxu1 %v84_v9  ;;  %v65_v57 = vld [vmem:[%s1645_s0 + $0x1a0] sm:$0xff]  ;;  %v34_v58 = vld [vmem:[%s1645_s0 + $0xa8] sm:$0xff]  ;;  %v35_v59 = vld [vmem:[%s1645_s0 + $0xb0] sm:$0xff] }
  0x15   :  { %856 = vmatpush3.msra.mxu0 %v83_v10  ;;  %974 = vmatprep.subr.mxu1 %v83_v10  ;;  %v66_v60 = vld [vmem:[%s1645_s0 + $0x1a8] sm:$0xff]  ;;  %v67_v61 = vld [vmem:[%s1645_s0 + $0x1b0] sm:$0xff]  ;;  %v36_v62 = vld [vmem:[%s1645_s0 + $0xb8] sm:$0xff] }
  0x16   :  { %857 = vmatprep.subr.mxu0 %v82_v11  ;;  %990 = vmatpush3.msra.mxu1 %v83_v10  ;;  %v37_v63 = vld [vmem:[%s1645_s0 + $0xc0] sm:$0xff]  ;;  %v68_v0 = vld [vmem:[%s1645_s0 + $0x1b8] sm:$0xff]  ;;  %v38_v2 = vld [vmem:[%s1645_s0 + $0xc8] sm:$0xff] }
  0x17   :  { %858 = vmatpush3.msra.mxu0 %v82_v11  ;;  %975 = vmatprep.subr.mxu1 %v82_v11  ;;  %v69_v1 = vld [vmem:[%s1645_s0 + $0x1c0] sm:$0xff]  ;;  %v39_v3 = vld [vmem:[%s1645_s0 + $0xd0] sm:$0xff]  ;;  %v70_v4 = vld [vmem:[%s1645_s0 + $0x1c8] sm:$0xff] }
  0x18   :  { %859 = vmatprep.subr.mxu0 %v81_v12  ;;  %991 = vmatpush3.msra.mxu1 %v82_v11  ;;  %v71_v5 = vld [vmem:[%s1645_s0 + $0x1d0] sm:$0xff]  ;;  %v40_v6 = vld [vmem:[%s1645_s0 + $0xd8] sm:$0xff]  ;;  %v41_v7 = vld [vmem:[%s1645_s0 + $0xe0] sm:$0xff] }
  0x19   :  { %860 = vmatpush3.msra.mxu0 %v81_v12  ;;  %976 = vmatprep.subr.mxu1 %v81_v12  ;;  %v72_v8 = vld [vmem:[%s1645_s0 + $0x1d8] sm:$0xff]  ;;  %v73_v9 = vld [vmem:[%s1645_s0 + $0x1e0] sm:$0xff]  ;;  %v42_v10 = vld [vmem:[%s1645_s0 + $0xe8] sm:$0xff] }
  0x1a   :  { %861 = vmatprep.subr.mxu0 %v80_v13  ;;  %992 = vmatpush3.msra.mxu1 %v81_v12  ;;  %v43_v11 = vld [vmem:[%s1645_s0 + $0xf0] sm:$0xff]  ;;  %v74_v12 = vld [vmem:[%s1645_s0 + $0x1e8] sm:$0xff] }
  0x1b   :  { %862 = vmatpush3.msra.mxu0 %v80_v13  ;;  %977 = vmatprep.subr.mxu1 %v80_v13 }
  0x1c   :  { %863 = vmatprep.subr.mxu0 %v79_v14  ;;  %993 = vmatpush3.msra.mxu1 %v80_v13  ;;  %v75_v13 = vld [vmem:[%s1645_s0 + $0x1f0] sm:$0xff] }
  0x1d   :  { %864 = vmatpush3.msra.mxu0 %v79_v14  ;;  %978 = vmatprep.subr.mxu1 %v79_v14 }
  0x1e   :  { %865 = vmatprep.subr.mxu0 %v78_v15  ;;  %994 = vmatpush3.msra.mxu1 %v79_v14  ;;  %v44_v14 = vld [vmem:[%s1645_s0 + $0xf8] sm:$0xff] }
  0x1f   :  { %866 = vmatpush3.msra.mxu0 %v78_v15  ;;  %979 = vmatprep.subr.mxu1 %v78_v15 }
  0x20   :  { %867 = vmatprep.subr.mxu0 %v77_v16  ;;  %995 = vmatpush3.msra.mxu1 %v78_v15  ;;  %v76_v15 = vld [vmem:[%s1645_s0 + $0x1f8] sm:$0xff] }
  0x21   :  { %868 = vmatpush3.msra.mxu0 %v77_v16  ;;  %980 = vmatprep.subr.mxu1 %v77_v16 }
  0x22   :  { %870 = vmatmul.mubr.f32.vlgmr.msra.gmra.mxu0 %v14_v17  ;;  %996 = vmatpush3.msra.mxu1 %v77_v16 }
  0x23   :  { %872 = vmatprep.mubr.f32.mxu0 %v15_v18  ;;  %917 = vmatprep.mubr.f32.mxu1 %v45_v19 }
  0x24   :  { %918 = vmatmul.mubr.f32.vlgmr.msra.gmra.mxu1 %v46_v20 }
  0x25   :  { %920 = vmatprep.mubr.f32.mxu1 %v47_v21 }
  0x26   :  { %873 = vmatmul.mubr.f32.gmra.mxu0 %v16_v22 }
  0x27   :  { %875 = vmatprep.mubr.f32.mxu0 %v17_v23 }
  0x28   :  { %921 = vmatmul.mubr.f32.gmra.mxu1 %v48_v24 }
  0x29   :  { %923 = vmatprep.mubr.f32.mxu1 %v49_v25 }
  0x2a   :  { %876 = vmatmul.mubr.f32.gmra.mxu0 %v18_v26 }
  0x2b   :  { %878 = vmatprep.mubr.f32.mxu0 %v19_v27 }
  0x2c   :  { %924 = vmatmul.mubr.f32.gmra.mxu1 %v50_v28 }
  0x2d   :  { %926 = vmatprep.mubr.f32.mxu1 %v51_v29 }
  0x2e   :  { %879 = vmatmul.mubr.f32.gmra.mxu0 %v20_v30 }
  0x2f   :  { %881 = vmatprep.mubr.f32.mxu0 %v21_v31 }
  0x30   :  { %927 = vmatmul.mubr.f32.gmra.mxu1 %v52_v32 }
  0x31   :  { %929 = vmatprep.mubr.f32.mxu1 %v53_v33 }
  0x32   :  { %882 = vmatmul.mubr.f32.gmra.mxu0 %v22_v34 }
  0x33   :  { %884 = vmatprep.mubr.f32.mxu0 %v23_v35 }
  0x34   :  { %930 = vmatmul.mubr.f32.gmra.mxu1 %v54_v36 }
  0x35   :  { %932 = vmatprep.mubr.f32.mxu1 %v55_v37 }
  0x36   :  { %885 = vmatmul.mubr.f32.gmra.mxu0 %v24_v38 }
  0x37   :  { %887 = vmatprep.mubr.f32.mxu0 %v25_v39 }
  0x38   :  { %933 = vmatmul.mubr.f32.gmra.mxu1 %v56_v40 }
  0x39   :  { %935 = vmatprep.mubr.f32.mxu1 %v57_v41 }
  0x3a   :  { %888 = vmatmul.mubr.f32.gmra.mxu0 %v26_v42 }
  0x3b   :  { %890 = vmatprep.mubr.f32.mxu0 %v27_v43 }
  0x3c   :  { %936 = vmatmul.mubr.f32.gmra.mxu1 %v58_v44 }
  0x3d   :  { %938 = vmatprep.mubr.f32.mxu1 %v59_v45 }
  0x3e   :  { %891 = vmatmul.mubr.f32.gmra.mxu0 %v28_v46 }
  0x3f   :  { %893 = vmatprep.mubr.f32.mxu0 %v29_v47 }
  0x40   :  { %939 = vmatmul.mubr.f32.gmra.mxu1 %v60_v48 }
  0x41   :  { %941 = vmatprep.mubr.f32.mxu1 %v61_v49 }
  0x42   :  { %894 = vmatmul.mubr.f32.gmra.mxu0 %v30_v50 }
  0x43   :  { %896 = vmatprep.mubr.f32.mxu0 %v31_v51 }
  0x44   :  { %942 = vmatmul.mubr.f32.gmra.mxu1 %v62_v52 }
  0x45   :  { %944 = vmatprep.mubr.f32.mxu1 %v63_v53 }
  0x46   :  { %897 = vmatmul.mubr.f32.gmra.mxu0 %v32_v54 }
  0x47   :  { %899 = vmatprep.mubr.f32.mxu0 %v33_v55 }
  0x48   :  { %945 = vmatmul.mubr.f32.gmra.mxu1 %v64_v56 }
  0x49   :  { %947 = vmatprep.mubr.f32.mxu1 %v65_v57 }
  0x4a   :  { %900 = vmatmul.mubr.f32.gmra.mxu0 %v34_v58 }
  0x4b   :  { %902 = vmatprep.mubr.f32.mxu0 %v35_v59 }
  0x4c   :  { %948 = vmatmul.mubr.f32.gmra.mxu1 %v66_v60 }
  0x4d   :  { %950 = vmatprep.mubr.f32.mxu1 %v67_v61 }
  0x4e   :  { %903 = vmatmul.mubr.f32.gmra.mxu0 %v36_v62 }
  0x4f   :  { %905 = vmatprep.mubr.f32.mxu0 %v37_v63 }
  0x50   :  { %951 = vmatmul.mubr.f32.gmra.mxu1 %v68_v0 }
  0x51   :  { %953 = vmatprep.mubr.f32.mxu1 %v69_v1 }
  0x52   :  { %906 = vmatmul.mubr.f32.gmra.mxu0 %v38_v2 }
  0x53   :  { %908 = vmatprep.mubr.f32.mxu0 %v39_v3 }
  0x54   :  { %954 = vmatmul.mubr.f32.gmra.mxu1 %v70_v4 }
  0x55   :  { %956 = vmatprep.mubr.f32.mxu1 %v71_v5 }
  0x56   :  { %909 = vmatmul.mubr.f32.gmra.mxu0 %v40_v6 }
  0x57   :  { %911 = vmatprep.mubr.f32.mxu0 %v41_v7 }
  0x58   :  { %957 = vmatmul.mubr.f32.gmra.mxu1 %v72_v8 }
  0x59   :  { %959 = vmatprep.mubr.f32.mxu1 %v73_v9 }
  0x5a   :  { %912 = vmatmul.mubr.f32.gmra.mxu0 %v42_v10 }
  0x5b   :  { %914 = vmatprep.mubr.f32.mxu0 %v43_v11 }
  0x5c   :  { %960 = vmatmul.mubr.f32.gmra.mxu1 %v74_v12 }
  0x5d   :  { %962 = vmatprep.mubr.f32.mxu1 %v75_v13 }
  0x5e   :  { %915 = vmatmul.mubr.f32.gmra.mxu0 %v44_v14 }
  0x60   :  { %963 = vmatmul.mubr.f32.gmra.mxu1 %v76_v15 }
  0xe2   :  { %v871_v16 = vpop.f32.mrf.mxu0 }
  0xe3   :  { %479 = vst [vmem:[%s1646_s2 + $0x8] sm:$0xff] %v871_v16  ;;  %v612_v22 = vmul.f32 %v871_v16, %v871_v16 }
  0xe4   :  { %v159_v17 = vpop.f32.mrf.mxu0  ;;  %v1260_v18 = vpop.f32.mrf.mxu1 }
  0xe5   :  { %478 = vst [vmem:[%s1646_s2] sm:$0xff] %v159_v17  ;;  %v611_v19 = vmul.f32 %v159_v17, %v159_v17  ;;  %511 = vst [vmem:[%s1646_s2 + $0x108] sm:$0xff] %v1260_v18  ;;  %v542_v23 = vadd.f32 %v871_v16, %v159_v17 }
  0xe6   :  { %v874_v20 = vpop.f32.mrf.mxu0  ;;  %v1269_v21 = vpop.f32.mrf.mxu1 }
  0xe7   :  { %481 = vst [vmem:[%s1646_s2 + $0x18] sm:$0xff] %v874_v20  ;;  %510 = vst [vmem:[%s1646_s2 + $0x100] sm:$0xff] %v1269_v21  ;;  %v675_v26 = vadd.f32 %v612_v22, %v611_v19  ;;  %v614_v31 = vmul.f32 %v874_v20, %v874_v20 }
  0xe8   :  { %v169_v24 = vpop.f32.mrf.mxu0  ;;  %v1278_v25 = vpop.f32.mrf.mxu1 }
  0xe9   :  { %480 = vst [vmem:[%s1646_s2 + $0x10] sm:$0xff] %v169_v24  ;;  %v543_v27 = vadd.f32 %v542_v23, %v169_v24  ;;  %v613_v28 = vmul.f32 %v169_v24, %v169_v24  ;;  %513 = vst [vmem:[%s1646_s2 + $0x118] sm:$0xff] %v1278_v25 }
  0xea   :  { %v877_v29 = vpop.f32.mrf.mxu0  ;;  %v1287_v30 = vpop.f32.mrf.mxu1 }
  0xeb   :  { %v676_v32 = vadd.f32 %v675_v26, %v613_v28  ;;  %483 = vst [vmem:[%s1646_s2 + $0x28] sm:$0xff] %v877_v29  ;;  %v544_v33 = vadd.f32 %v874_v20, %v543_v27  ;;  %512 = vst [vmem:[%s1646_s2 + $0x110] sm:$0xff] %v1287_v30  ;;  %v616_v41 = vmul.f32 %v877_v29, %v877_v29 }
  0xec   :  { %v179_v34 = vpop.f32.mrf.mxu0  ;;  %v1296_v35 = vpop.f32.mrf.mxu1 }
  0xed   :  { %482 = vst [vmem:[%s1646_s2 + $0x20] sm:$0xff] %v179_v34  ;;  %v545_v36 = vadd.f32 %v544_v33, %v179_v34  ;;  %v615_v37 = vmul.f32 %v179_v34, %v179_v34  ;;  %v677_v38 = vadd.f32 %v676_v32, %v614_v31  ;;  %515 = vst [vmem:[%s1646_s2 + $0x128] sm:$0xff] %v1296_v35 }
  0xee   :  { %v880_v39 = vpop.f32.mrf.mxu0  ;;  %v1305_v40 = vpop.f32.mrf.mxu1 }
  0xef   :  { %v678_v42 = vadd.f32 %v677_v38, %v615_v37  ;;  %485 = vst [vmem:[%s1646_s2 + $0x38] sm:$0xff] %v880_v39  ;;  %v546_v43 = vadd.f32 %v877_v29, %v545_v36  ;;  %514 = vst [vmem:[%s1646_s2 + $0x120] sm:$0xff] %v1305_v40  ;;  %v618_v51 = vmul.f32 %v880_v39, %v880_v39 }
  0xf0   :  { %v189_v44 = vpop.f32.mrf.mxu0  ;;  %v1314_v45 = vpop.f32.mrf.mxu1 }
  0xf1   :  { %484 = vst [vmem:[%s1646_s2 + $0x30] sm:$0xff] %v189_v44  ;;  %v547_v46 = vadd.f32 %v546_v43, %v189_v44  ;;  %v617_v47 = vmul.f32 %v189_v44, %v189_v44  ;;  %v679_v48 = vadd.f32 %v678_v42, %v616_v41  ;;  %517 = vst [vmem:[%s1646_s2 + $0x138] sm:$0xff] %v1314_v45 }
  0xf2   :  { %v883_v49 = vpop.f32.mrf.mxu0  ;;  %v1323_v50 = vpop.f32.mrf.mxu1 }
  0xf3   :  { %v680_v52 = vadd.f32 %v679_v48, %v617_v47  ;;  %487 = vst [vmem:[%s1646_s2 + $0x48] sm:$0xff] %v883_v49  ;;  %v548_v53 = vadd.f32 %v880_v39, %v547_v46  ;;  %516 = vst [vmem:[%s1646_s2 + $0x130] sm:$0xff] %v1323_v50  ;;  %v620_v61 = vmul.f32 %v883_v49, %v883_v49 }
  0xf4   :  { %v199_v54 = vpop.f32.mrf.mxu0  ;;  %v1332_v55 = vpop.f32.mrf.mxu1 }
  0xf5   :  { %486 = vst [vmem:[%s1646_s2 + $0x40] sm:$0xff] %v199_v54  ;;  %v549_v56 = vadd.f32 %v548_v53, %v199_v54  ;;  %v619_v57 = vmul.f32 %v199_v54, %v199_v54  ;;  %v681_v58 = vadd.f32 %v680_v52, %v618_v51  ;;  %519 = vst [vmem:[%s1646_s2 + $0x148] sm:$0xff] %v1332_v55 }
  0xf6   :  { %v886_v59 = vpop.f32.mrf.mxu0  ;;  %v1341_v60 = vpop.f32.mrf.mxu1 }
  0xf7   :  { %v682_v62 = vadd.f32 %v681_v58, %v619_v57  ;;  %489 = vst [vmem:[%s1646_s2 + $0x58] sm:$0xff] %v886_v59  ;;  %v550_v63 = vadd.f32 %v883_v49, %v549_v56  ;;  %518 = vst [vmem:[%s1646_s2 + $0x140] sm:$0xff] %v1341_v60  ;;  %v622_v7 = vmul.f32 %v886_v59, %v886_v59 }
  0xf8   :  { %v209_v0 = vpop.f32.mrf.mxu0  ;;  %v1350_v1 = vpop.f32.mrf.mxu1 }
  0xf9   :  { %488 = vst [vmem:[%s1646_s2 + $0x50] sm:$0xff] %v209_v0  ;;  %v551_v2 = vadd.f32 %v550_v63, %v209_v0  ;;  %v621_v3 = vmul.f32 %v209_v0, %v209_v0  ;;  %v683_v4 = vadd.f32 %v682_v62, %v620_v61  ;;  %521 = vst [vmem:[%s1646_s2 + $0x158] sm:$0xff] %v1350_v1 }
  0xfa   :  { %v889_v5 = vpop.f32.mrf.mxu0  ;;  %v1359_v6 = vpop.f32.mrf.mxu1 }
  0xfb   :  { %v684_v8 = vadd.f32 %v683_v4, %v621_v3  ;;  %491 = vst [vmem:[%s1646_s2 + $0x68] sm:$0xff] %v889_v5  ;;  %v552_v9 = vadd.f32 %v886_v59, %v551_v2  ;;  %520 = vst [vmem:[%s1646_s2 + $0x150] sm:$0xff] %v1359_v6  ;;  %v624_v17 = vmul.f32 %v889_v5, %v889_v5 }
  0xfc   :  { %v219_v10 = vpop.f32.mrf.mxu0  ;;  %v1368_v11 = vpop.f32.mrf.mxu1 }
  0xfd   :  { %490 = vst [vmem:[%s1646_s2 + $0x60] sm:$0xff] %v219_v10  ;;  %v553_v12 = vadd.f32 %v552_v9, %v219_v10  ;;  %v623_v13 = vmul.f32 %v219_v10, %v219_v10  ;;  %v685_v14 = vadd.f32 %v684_v8, %v622_v7  ;;  %523 = vst [vmem:[%s1646_s2 + $0x168] sm:$0xff] %v1368_v11 }
  0xfe   :  { %v892_v15 = vpop.f32.mrf.mxu0  ;;  %v1377_v16 = vpop.f32.mrf.mxu1 }
  0xff   :  { %v686_v19 = vadd.f32 %v685_v14, %v623_v13  ;;  %493 = vst [vmem:[%s1646_s2 + $0x78] sm:$0xff] %v892_v15  ;;  %v554_v20 = vadd.f32 %v889_v5, %v553_v12  ;;  %522 = vst [vmem:[%s1646_s2 + $0x160] sm:$0xff] %v1377_v16  ;;  %v626_v31 = vmul.f32 %v892_v15, %v892_v15 }
 0x100   :  { %v229_v22 = vpop.f32.mrf.mxu0  ;;  %v1386_v23 = vpop.f32.mrf.mxu1 }
 0x101   :  { %492 = vst [vmem:[%s1646_s2 + $0x70] sm:$0xff] %v229_v22  ;;  %v555_v24 = vadd.f32 %v554_v20, %v229_v22  ;;  %v625_v26 = vmul.f32 %v229_v22, %v229_v22  ;;  %v687_v27 = vadd.f32 %v686_v19, %v624_v17  ;;  %525 = vst [vmem:[%s1646_s2 + $0x178] sm:$0xff] %v1386_v23 }
 0x102   :  { %v895_v28 = vpop.f32.mrf.mxu0  ;;  %v1395_v29 = vpop.f32.mrf.mxu1 }
 0x103   :  { %v688_v32 = vadd.f32 %v687_v27, %v625_v26  ;;  %495 = vst [vmem:[%s1646_s2 + $0x88] sm:$0xff] %v895_v28  ;;  %v556_v33 = vadd.f32 %v892_v15, %v555_v24  ;;  %524 = vst [vmem:[%s1646_s2 + $0x170] sm:$0xff] %v1395_v29  ;;  %v628_v43 = vmul.f32 %v895_v28, %v895_v28 }
 0x104   :  { %v239_v34 = vpop.f32.mrf.mxu0  ;;  %v1404_v36 = vpop.f32.mrf.mxu1 }
 0x105   :  { %494 = vst [vmem:[%s1646_s2 + $0x80] sm:$0xff] %v239_v34  ;;  %v557_v37 = vadd.f32 %v556_v33, %v239_v34  ;;  %v627_v38 = vmul.f32 %v239_v34, %v239_v34  ;;  %v689_v39 = vadd.f32 %v688_v32, %v626_v31  ;;  %527 = vst [vmem:[%s1646_s2 + $0x188] sm:$0xff] %v1404_v36 }
 0x106   :  { %v898_v41 = vpop.f32.mrf.mxu0  ;;  %v1413_v42 = vpop.f32.mrf.mxu1 }
 0x107   :  { %v690_v44 = vadd.f32 %v689_v39, %v627_v38  ;;  %497 = vst [vmem:[%s1646_s2 + $0x98] sm:$0xff] %v898_v41  ;;  %v558_v46 = vadd.f32 %v895_v28, %v557_v37  ;;  %526 = vst [vmem:[%s1646_s2 + $0x180] sm:$0xff] %v1413_v42  ;;  %v630_v56 = vmul.f32 %v898_v41, %v898_v41 }
 0x108   :  { %v249_v47 = vpop.f32.mrf.mxu0  ;;  %v1422_v48 = vpop.f32.mrf.mxu1 }
 0x109   :  { %496 = vst [vmem:[%s1646_s2 + $0x90] sm:$0xff] %v249_v47  ;;  %v559_v49 = vadd.f32 %v558_v46, %v249_v47  ;;  %v629_v51 = vmul.f32 %v249_v47, %v249_v47  ;;  %v691_v52 = vadd.f32 %v690_v44, %v628_v43  ;;  %529 = vst [vmem:[%s1646_s2 + $0x198] sm:$0xff] %v1422_v48 }
 0x10a   :  { %v901_v53 = vpop.f32.mrf.mxu0  ;;  %v1431_v54 = vpop.f32.mrf.mxu1 }
 0x10b   :  { %v692_v57 = vadd.f32 %v691_v52, %v629_v51  ;;  %499 = vst [vmem:[%s1646_s2 + $0xa8] sm:$0xff] %v901_v53  ;;  %v560_v58 = vadd.f32 %v898_v41, %v559_v49  ;;  %528 = vst [vmem:[%s1646_s2 + $0x190] sm:$0xff] %v1431_v54  ;;  %v632_v4 = vmul.f32 %v901_v53, %v901_v53 }
 0x10c   :  { %v259_v59 = vpop.f32.mrf.mxu0  ;;  %v1440_v61 = vpop.f32.mrf.mxu1 }
 0x10d   :  { %498 = vst [vmem:[%s1646_s2 + $0xa0] sm:$0xff] %v259_v59  ;;  %v561_v62 = vadd.f32 %v560_v58, %v259_v59  ;;  %v631_v63 = vmul.f32 %v259_v59, %v259_v59  ;;  %v693_v0 = vadd.f32 %v692_v57, %v630_v56  ;;  %531 = vst [vmem:[%s1646_s2 + $0x1a8] sm:$0xff] %v1440_v61 }
 0x10e   :  { %v904_v2 = vpop.f32.mrf.mxu0  ;;  %v1449_v3 = vpop.f32.mrf.mxu1 }
 0x10f   :  { %v694_v5 = vadd.f32 %v693_v0, %v631_v63  ;;  %501 = vst [vmem:[%s1646_s2 + $0xb8] sm:$0xff] %v904_v2  ;;  %v562_v7 = vadd.f32 %v901_v53, %v561_v62  ;;  %530 = vst [vmem:[%s1646_s2 + $0x1a0] sm:$0xff] %v1449_v3  ;;  %v634_v17 = vmul.f32 %v904_v2, %v904_v2 }
 0x110   :  { %v269_v8 = vpop.f32.mrf.mxu0  ;;  %v1458_v9 = vpop.f32.mrf.mxu1 }
 0x111   :  { %500 = vst [vmem:[%s1646_s2 + $0xb0] sm:$0xff] %v269_v8  ;;  %v563_v10 = vadd.f32 %v562_v7, %v269_v8  ;;  %v633_v12 = vmul.f32 %v269_v8, %v269_v8  ;;  %v695_v13 = vadd.f32 %v694_v5, %v632_v4  ;;  %533 = vst [vmem:[%s1646_s2 + $0x1b8] sm:$0xff] %v1458_v9 }
 0x112   :  { %v907_v14 = vpop.f32.mrf.mxu0  ;;  %v1467_v15 = vpop.f32.mrf.mxu1 }
 0x113   :  { %v696_v19 = vadd.f32 %v695_v13, %v633_v12  ;;  %503 = vst [vmem:[%s1646_s2 + $0xc8] sm:$0xff] %v907_v14  ;;  %v564_v20 = vadd.f32 %v904_v2, %v563_v10  ;;  %532 = vst [vmem:[%s1646_s2 + $0x1b0] sm:$0xff] %v1467_v15  ;;  %v636_v33 = vmul.f32 %v907_v14, %v907_v14 }
 0x114   :  { %v279_v22 = vpop.f32.mrf.mxu0  ;;  %v1476_v24 = vpop.f32.mrf.mxu1 }
 0x115   :  { %502 = vst [vmem:[%s1646_s2 + $0xc0] sm:$0xff] %v279_v22  ;;  %v565_v26 = vadd.f32 %v564_v20, %v279_v22  ;;  %v635_v27 = vmul.f32 %v279_v22, %v279_v22  ;;  %v697_v28 = vadd.f32 %v696_v19, %v634_v17  ;;  %535 = vst [vmem:[%s1646_s2 + $0x1c8] sm:$0xff] %v1476_v24 }
 0x116   :  { %v910_v31 = vpop.f32.mrf.mxu0  ;;  %v1485_v32 = vpop.f32.mrf.mxu1 }
 0x117   :  { %v698_v34 = vadd.f32 %v697_v28, %v635_v27  ;;  %505 = vst [vmem:[%s1646_s2 + $0xd8] sm:$0xff] %v910_v31  ;;  %v566_v37 = vadd.f32 %v907_v14, %v565_v26  ;;  %534 = vst [vmem:[%s1646_s2 + $0x1c0] sm:$0xff] %v1485_v32  ;;  %v638_v49 = vmul.f32 %v910_v31, %v910_v31 }
 0x118   :  { %v289_v38 = vpop.f32.mrf.mxu0  ;;  %v1494_v39 = vpop.f32.mrf.mxu1  ;;  %v643_v26 = vmul.f32 %v1269_v21, %v1269_v21  ;;  %v644_v27 = vmul.f32 %v1260_v18, %v1260_v18 }
 0x119   :  { %504 = vst [vmem:[%s1646_s2 + $0xd0] sm:$0xff] %v289_v38  ;;  %v567_v41 = vadd.f32 %v566_v37, %v289_v38  ;;  %v637_v43 = vmul.f32 %v289_v38, %v289_v38  ;;  %v699_v44 = vadd.f32 %v698_v34, %v636_v33  ;;  %537 = vst [vmem:[%s1646_s2 + $0x1d8] sm:$0xff] %v1494_v39 }
 0x11a   :  { %v913_v46 = vpop.f32.mrf.mxu0  ;;  %v1503_v47 = vpop.f32.mrf.mxu1  ;;  %v645_v34 = vmul.f32 %v1287_v30, %v1287_v30  ;;  %v646_v38 = vmul.f32 %v1278_v25, %v1278_v25 }
 0x11b   :  { %v700_v51 = vadd.f32 %v699_v44, %v637_v43  ;;  %507 = vst [vmem:[%s1646_s2 + $0xe8] sm:$0xff] %v913_v46  ;;  %v568_v52 = vadd.f32 %v910_v31, %v567_v41  ;;  %536 = vst [vmem:[%s1646_s2 + $0x1d0] sm:$0xff] %v1503_v47  ;;  %v640_v0 = vmul.f32 %v913_v46, %v913_v46 }
 0x11c   :  { %v299_v53 = vpop.f32.mrf.mxu0  ;;  %v1512_v56 = vpop.f32.mrf.mxu1  ;;  %v647_v44 = vmul.f32 %v1305_v40, %v1305_v40 }
 0x11d   :  { %506 = vst [vmem:[%s1646_s2 + $0xe0] sm:$0xff] %v299_v53  ;;  %v569_v57 = vadd.f32 %v568_v52, %v299_v53  ;;  %v639_v58 = vmul.f32 %v299_v53, %v299_v53  ;;  %v701_v59 = vadd.f32 %v700_v51, %v638_v49  ;;  %539 = vst [vmem:[%s1646_s2 + $0x1e8] sm:$0xff] %v1512_v56 }
 0x11e   :  { %v916_v62 = vpop.f32.mrf.mxu0  ;;  %v1521_v63 = vpop.f32.mrf.mxu1  ;;  %v649_v52 = vmul.f32 %v1323_v50, %v1323_v50 }
 0x11f   :  { %v702_v2 = vadd.f32 %v701_v59, %v639_v58  ;;  %509 = vst [vmem:[%s1646_s2 + $0xf8] sm:$0xff] %v916_v62  ;;  %v570_v4 = vadd.f32 %v913_v46, %v569_v57  ;;  %538 = vst [vmem:[%s1646_s2 + $0x1e0] sm:$0xff] %v1521_v63  ;;  %v642_v14 = vmul.f32 %v916_v62, %v916_v62 }
 0x120   :  { %v309_v5 = vpop.f32.mrf.mxu0  ;;  %v1530_v7 = vpop.f32.mrf.mxu1  ;;  %v651_v59 = vmul.f32 %v1341_v60, %v1341_v60 }
 0x121   :  { %508 = vst [vmem:[%s1646_s2 + $0xf0] sm:$0xff] %v309_v5  ;;  %v571_v8 = vadd.f32 %v570_v4, %v309_v5  ;;  %v641_v10 = vmul.f32 %v309_v5, %v309_v5  ;;  %v703_v12 = vadd.f32 %v702_v2, %v640_v0  ;;  %541 = vst [vmem:[%s1646_s2 + $0x1f8] sm:$0xff] %v1530_v7 }
 0x122   :  { %v1539_v13 = vpop.f32.mrf.mxu1  ;;  %v653_v4 = vmul.f32 %v1359_v6, %v1359_v6 }
 0x123   :  { %v572_v17 = vadd.f32 %v916_v62, %v571_v8  ;;  %v704_v19 = vadd.f32 %v703_v12, %v641_v10  ;;  %540 = vst [vmem:[%s1646_s2 + $0x1f0] sm:$0xff] %v1539_v13  ;;  %v655_v12 = vmul.f32 %v1377_v16, %v1377_v16 }
 0x125   :  { %v705_v20 = vadd.f32 %v704_v19, %v642_v14  ;;  %v573_v22 = vadd.f32 %v572_v17, %v1269_v21 }
 0x127   :  { %v706_v28 = vadd.f32 %v705_v20, %v643_v26  ;;  %v574_v31 = vadd.f32 %v1260_v18, %v573_v22  ;;  %v648_v18 = vmul.f32 %v1296_v35, %v1296_v35  ;;  %v657_v20 = vmul.f32 %v1395_v29, %v1395_v29 }
 0x129   :  { %v575_v33 = vadd.f32 %v574_v31, %v1287_v30  ;;  %v707_v37 = vadd.f32 %v706_v28, %v644_v27  ;;  %v659_v28 = vmul.f32 %v1413_v42, %v1413_v42 }
 0x12b   :  { %v708_v41 = vadd.f32 %v707_v37, %v645_v34  ;;  %v576_v43 = vadd.f32 %v1278_v25, %v575_v33  ;;  %v650_v25 = vmul.f32 %v1314_v45, %v1314_v45  ;;  %v661_v37 = vmul.f32 %v1431_v54, %v1431_v54 }
 0x12d   :  { %v577_v21 = vadd.f32 %v576_v43, %v1305_v40  ;;  %v709_v46 = vadd.f32 %v708_v41, %v646_v38 }
 0x12f   :  { %v710_v49 = vadd.f32 %v709_v46, %v647_v44  ;;  %v578_v51 = vadd.f32 %v1296_v35, %v577_v21  ;;  %v652_v35 = vmul.f32 %v1332_v55, %v1332_v55  ;;  %v663_v21 = vmul.f32 %v1449_v3, %v1449_v3 }
 0x131   :  { %v579_v30 = vadd.f32 %v578_v51, %v1323_v50  ;;  %v711_v53 = vadd.f32 %v710_v49, %v648_v18  ;;  %v665_v49 = vmul.f32 %v1467_v15, %v1467_v15 }
 0x133   :  { %v712_v57 = vadd.f32 %v711_v53, %v649_v52  ;;  %v580_v58 = vadd.f32 %v1314_v45, %v579_v30  ;;  %v654_v45 = vmul.f32 %v1350_v1, %v1350_v1  ;;  %v667_v53 = vmul.f32 %v1485_v32, %v1485_v32 }
 0x135   :  { %v581_v40 = vadd.f32 %v580_v58, %v1341_v60  ;;  %v713_v62 = vadd.f32 %v712_v57, %v650_v25 }
 0x137   :  { %v714_v0 = vadd.f32 %v713_v62, %v651_v59  ;;  %v582_v2 = vadd.f32 %v1332_v55, %v581_v40  ;;  %v656_v55 = vmul.f32 %v1368_v11, %v1368_v11  ;;  %v669_v40 = vmul.f32 %v1503_v47, %v1503_v47 }
 0x139   :  { %v583_v50 = vadd.f32 %v582_v2, %v1359_v6  ;;  %v715_v5 = vadd.f32 %v714_v0, %v652_v35  ;;  %v671_v0 = vmul.f32 %v1521_v63, %v1521_v63 }
 0x13b   :  { %v716_v8 = vadd.f32 %v715_v5, %v653_v4  ;;  %v584_v10 = vadd.f32 %v1350_v1, %v583_v50  ;;  %v658_v1 = vmul.f32 %v1386_v23, %v1386_v23  ;;  %v673_v5 = vmul.f32 %v1539_v13, %v1539_v13 }
 0x13d   :  { %v585_v60 = vadd.f32 %v584_v10, %v1377_v16  ;;  %v717_v14 = vadd.f32 %v716_v8, %v654_v45 }
 0x13f   :  { %v718_v17 = vadd.f32 %v717_v14, %v655_v12  ;;  %v586_v19 = vadd.f32 %v1368_v11, %v585_v60  ;;  %v660_v11 = vmul.f32 %v1404_v36, %v1404_v36 }
 0x141   :  { %v587_v6 = vadd.f32 %v586_v19, %v1395_v29  ;;  %v719_v22 = vadd.f32 %v718_v17, %v656_v55 }
 0x143   :  { %v720_v26 = vadd.f32 %v719_v22, %v657_v20  ;;  %v588_v27 = vadd.f32 %v1386_v23, %v587_v6  ;;  %v662_v23 = vmul.f32 %v1422_v48, %v1422_v48 }
 0x145   :  { %v589_v16 = vadd.f32 %v588_v27, %v1413_v42  ;;  %v721_v31 = vadd.f32 %v720_v26, %v658_v1 }
 0x147   :  { %v722_v33 = vadd.f32 %v721_v31, %v659_v28  ;;  %v590_v34 = vadd.f32 %v1404_v36, %v589_v16  ;;  %v664_v36 = vmul.f32 %v1440_v61, %v1440_v61 }
 0x149   :  { %v591_v29 = vadd.f32 %v590_v34, %v1431_v54  ;;  %v723_v38 = vadd.f32 %v722_v33, %v660_v11 }
 0x14b   :  { %v724_v41 = vadd.f32 %v723_v38, %v661_v37  ;;  %v592_v43 = vadd.f32 %v1422_v48, %v591_v29  ;;  %v666_v48 = vmul.f32 %v1458_v9, %v1458_v9 }
 0x14d   :  { %v593_v42 = vadd.f32 %v592_v43, %v1449_v3  ;;  %v725_v44 = vadd.f32 %v724_v41, %v662_v23 }
 0x14f   :  { %v726_v46 = vadd.f32 %v725_v44, %v663_v21  ;;  %v594_v18 = vadd.f32 %v1440_v61, %v593_v42  ;;  %v668_v61 = vmul.f32 %v1476_v24, %v1476_v24 }
 0x151   :  { %v595_v54 = vadd.f32 %v594_v18, %v1467_v15  ;;  %v727_v51 = vadd.f32 %v726_v46, %v664_v36 }
 0x153   :  { %v728_v30 = vadd.f32 %v727_v51, %v665_v49  ;;  %v596_v52 = vadd.f32 %v1458_v9, %v595_v54  ;;  %v670_v9 = vmul.f32 %v1494_v39, %v1494_v39 }
 0x155   :  { %v597_v3 = vadd.f32 %v596_v52, %v1485_v32  ;;  %v729_v25 = vadd.f32 %v728_v30, %v666_v48 }
 0x157   :  { %v730_v57 = vadd.f32 %v729_v25, %v667_v53  ;;  %v598_v58 = vadd.f32 %v1476_v24, %v597_v3  ;;  %v672_v24 = vmul.f32 %v1512_v56, %v1512_v56 }
 0x159   :  { %v599_v15 = vadd.f32 %v598_v58, %v1503_v47  ;;  %v731_v59 = vadd.f32 %v730_v57, %v668_v61 }
 0x15b   :  { %v732_v62 = vadd.f32 %v731_v59, %v669_v40  ;;  %v600_v35 = vadd.f32 %v1494_v39, %v599_v15  ;;  %v674_v39 = vmul.f32 %v1530_v7, %v1530_v7 }
 0x15d   :  { %v601_v32 = vadd.f32 %v600_v35, %v1521_v63  ;;  %v733_v2 = vadd.f32 %v732_v62, %v670_v9 }
 0x15f   :  { %v734_v50 = vadd.f32 %v733_v2, %v671_v0  ;;  %v602_v4 = vadd.f32 %v1512_v56, %v601_v32 }
 0x161   :  { %v603_v47 = vadd.f32 %v602_v4, %v1539_v13  ;;  %v735_v45 = vadd.f32 %v734_v50, %v672_v24 }
 0x163   :  { %v604_v8 = vadd.f32 %v1530_v7, %v603_v47  ;;  %v736_v10 = vadd.f32 %v735_v45, %v673_v5 }
 0x165   :  { %v605_v63 = vrot.slane %v604_v8, 4  ;;  %v737_v60 = vadd.f32 %v736_v10, %v674_v39 }
 0x167   :  { %v606_v12 = vadd.f32 %v605_v63, %v604_v8  ;;  %v738_v14 = vrot.slane %v737_v60, 4 }
 0x169   :  { %v607_v55 = vrot.slane %v606_v12, 2  ;;  %v739_v17 = vadd.f32 %v738_v14, %v737_v60 }
 0x16b   :  { %v608_v19 = vadd.f32 %v607_v55, %v606_v12  ;;  %v740_v56 = vrot.slane %v739_v17, 2 }
 0x16d   :  { %v609_v6 = vrot.slane %v608_v19, 1  ;;  %v741_v20 = vadd.f32 %v740_v56, %v739_v17 }
 0x16f   :  { %v742_v22 = vrot.slane %v741_v20, 1  ;;  %v610_v13 = vadd.f32 %v609_v6, %v608_v19 }
 0x171   :  { %v743_v1 = vadd.f32 %v742_v22, %v741_v20 }
 0x173   :  { %v745_v26 = vsel %vm744_vm0, %v610_v13, %v743_v1 }
 0x174   :  { %v747_v27 = vsel %vm746_vm1, %v745_v26, 0.0 }
 0x175   :  { %748 = vst [vmem:[%s1647_s3] sm:$0xff] %v747_v27 }

</bundles_post_ra>
